<compile_context>
chip_gen: v5e
topology: v5e:2x2
jax: 0.10.0
libtpu: 0.0.40
codegen_flags: <defaults>
</compile_context>

<pallas_src>
import math

import jax
import jax.numpy as jnp
from jax.experimental import pallas as pl
from jax.experimental.pallas import tpu as pltpu


_LANES = 1024          # lane-dense width: large multiple of 128
_MAX_TILE_ROWS = 1024  # 1024 x 1024 f32 tile = 4 MiB -> <= 16 MiB double-buffered


def _round_up(a, b):
    return (a + b - 1) // b * b


def _make_normalize_kernel(mean, inv_std, compute_dtype):
    mean = float(mean)
    inv_std = float(inv_std)

    def kernel(x_ref, o_ref):
        x = x_ref[...]
        if x.dtype != compute_dtype:
            x = x.astype(compute_dtype)
        # Python-float scalars are weakly typed: no promotion to f32 when the
        # compute dtype is bf16 (bf16 VALUs on v6e/v7x).
        y = (x - mean) * inv_std
        o_ref[...] = y.astype(o_ref.dtype)

    return kernel


def normalize(x, mean=0.0, std=1.0):
    """(x - mean) / std, semantics identical to the PyTorch module."""
    orig_shape = x.shape
    orig_dtype = x.dtype
    total = math.prod(orig_shape) if orig_shape else 1

    # Compute in the input's floating dtype (bf16 math on v6e/v7x); fall back
    # to f32 for non-floating inputs.
    compute_dtype = (
        orig_dtype if jnp.issubdtype(orig_dtype, jnp.floating) else jnp.float32
    )

    # Lane-dense reshape: (rows, 1024), padding the tail if needed.
    padded_total = _round_up(total, _LANES)
    rows = padded_total // _LANES
    if rows <= _MAX_TILE_ROWS:
        tile_rows = rows                 # single block == full array dims (always legal)
    else:
        tile_rows = _MAX_TILE_ROWS       # multiple of 8 -> valid sublane tiling
        rows = _round_up(rows, tile_rows)
        padded_total = rows * _LANES

    flat = x.reshape(-1)
    if padded_total != total:
        flat = jnp.pad(flat, (0, padded_total - total))
    x2d = flat.reshape(rows, _LANES)

    grid = (rows // tile_rows,)
    kernel = _make_normalize_kernel(mean, 1.0 / std, compute_dtype)

    out2d = pl.pallas_call(
        kernel,
        out_shape=jax.ShapeDtypeStruct((rows, _LANES), orig_dtype),
        grid_spec=pltpu.PrefetchScalarGridSpec(
            num_scalar_prefetch=0,
            grid=grid,
            in_specs=[pl.BlockSpec((tile_rows, _LANES), lambda i: (i, 0))],
            out_specs=pl.BlockSpec((tile_rows, _LANES), lambda i: (i, 0)),
        ),
        compiler_params=pltpu.CompilerParams(
            dimension_semantics=("parallel",),
        ),
    )(x2d)

    out_flat = out2d.reshape(-1)
    if padded_total != total:
        out_flat = out_flat[:total]
    return out_flat.reshape(orig_shape)


if __name__ == "__main__":
    key = jax.random.PRNGKey(0)
    # NCHW input, small shape: batch=2, channels=4, spatial=16x16
    x = jax.random.normal(key, (2, 4, 16, 16), dtype=jnp.float32)

    mean, std = 0.5, 2.0  # deterministic "parameters" of the module
    out = normalize(x, mean=mean, std=std)
    out = jax.block_until_ready(out)

    # correctness check against plain-JAX reference
    ref = (x - mean) / std
    assert out.shape == x.shape and out.dtype == x.dtype
    assert jnp.allclose(out, ref, atol=1e-6, rtol=1e-6)

    print("KERNEL_OK")
</pallas_src>

<mosaic_0001>
module attributes {stable_mosaic.version = 11 : i64} {
  func.func @kernel(%arg0: i32, %arg1: memref<2x1024xf32, #tpu.memory_space<vmem>>, %arg2: memref<2x1024xf32, #tpu.memory_space<vmem>>) attributes {dimension_semantics = [#tpu.dimension_semantics<parallel>], iteration_bounds = array<i64: 1>, scalar_prefetch = 0 : i64, scratch_operands = 0 : i64, tpu.core_type = #tpu.core_type<tc>, window_params = [{transform_indices = @transform_0, window_bounds = array<i64: 2, 1024>}, {transform_indices = @transform_1, window_bounds = array<i64: 2, 1024>}]} {
    %c0 = arith.constant 0 : index
    %c0_0 = arith.constant 0 : index
    %0 = vector.load %arg1[%c0, %c0_0] : memref<2x1024xf32, #tpu.memory_space<vmem>>, vector<2x1024xf32>
    %cst = arith.constant 5.000000e-01 : f32
    %1 = vector.broadcast %cst : f32 to vector<2x1024xf32>
    %2 = arith.subf %0, %1 : vector<2x1024xf32>
    %cst_1 = arith.constant 5.000000e-01 : f32
    %3 = vector.broadcast %cst_1 : f32 to vector<2x1024xf32>
    %4 = arith.mulf %2, %3 : vector<2x1024xf32>
    %c0_2 = arith.constant 0 : index
    %c0_3 = arith.constant 0 : index
    %5 = vector.load %arg2[%c0_2, %c0_3] : memref<2x1024xf32, #tpu.memory_space<vmem>>, vector<2x1024xf32>
    tpu.vector_store %arg2[%c0_2, %c0_3], %4 {strides = array<i32>} : memref<2x1024xf32, #tpu.memory_space<vmem>>, vector<2x1024xf32>,
    return
  }
  func.func @transform_0(%arg0: i32) -> (i32, i32) {
    %c0_i32 = arith.constant 0 : i32
    %c0_i32_0 = arith.constant 0 : i32
    return %arg0, %c0_i32 : i32, i32
  }
  func.func @transform_1(%arg0: i32) -> (i32, i32) {
    %c0_i32 = arith.constant 0 : i32
    %c0_i32_0 = arith.constant 0 : i32
    return %arg0, %c0_i32 : i32, i32
  }
}

</mosaic_0001>

<bundles_post_ra>
// kernel: tpu_custom_call.1
= control target key start
LH: loop header
LB: loop body
LE: loop exit
PB: predicated region body
PF: predicated region fallthrough
CT: control target
= control target key end

     0   :  { %6 = vsyncpa [#allocation3], 0  ;;  %s122_s0 = inlined_call_operand.hbm [shape: f32[2,1024], index: 0, kind: input, shape index: {}]   ;;  %s123_s1 = inlined_call_operand.hbm [shape: f32[2,1024], index: 1, kind: output, shape index: {}]  }
   0x1   :  { %7 = vsyncpa [#allocation4], 0  ;;  %s13_s8 = sshll.u32 %s122_s0, 4  ;;  %s104_s9 = smov [#allocation2]   ;;  %s14_s8 = int_to_ptr.hbm [resolvable:$true] %s13_s8 }
   0x2   :  { %s15_s10 = sshll.u32 %s104_s9, 4  ;;  %s16_s10 = int_to_ptr.vmem [resolvable:$true] %s15_s10 }
   0x3   :  { %18 = dma.hbm_to_vmem [thread:$0]  %s14_s8, 256, %s16_s10, [#allocation3]  }
   0x4   :  { %100 = dma.done.wait [#allocation3], 256  }
   0x5   :  { %101 = vsyncadd [#allocation3], 4294967040  ;;  %v23_v0 = vld [vmem:[#allocation2] sm:$0xff]  ;;  %v24_v1 = vld [vmem:[#allocation2 + $0x8] sm:$0xff]  ;;  %s105_s11 = smov [#allocation5]   ;;  %s38_s15 = sshll.u32 %s123_s1, 4  ;;  %s39_s15 = int_to_ptr.hbm [resolvable:$true] %s38_s15 }
   0x6   :  { %v48_v2 = vadd.f32 -0.5, %v23_v0  ;;  %v49_v3 = vadd.f32 -0.5, %v24_v1  ;;  %s36_s12 = sshll.u32 %s105_s11, 4  ;;  %s37_s12 = int_to_ptr.vmem [resolvable:$true] %s36_s12 }
   0x8   :  { %v27_v4 = vmul.f32 0.5, %v48_v2  ;;  %v28_v5 = vmul.f32 0.5, %v49_v3 }
   0xa   :  { %29 = vst [vmem:[#allocation5] sm:$0xff] %v27_v4 }
   0xb   :  { %30 = vst [vmem:[#allocation5 + $0x8] sm:$0xff] %v28_v5 }
   0xc   :  { %41 = dma.vmem_to_hbm [thread:$0]  %s37_s12, 256, %s39_s15, [#allocation4]  }
   0xd   :  { %102 = dma.done.wait [#allocation4], 256  }
   0xe   :  { %103 = vsyncadd [#allocation4], 4294967040 }
   0xf   :  { %46 = vsyncpa [#allocation3], 1 }
  0x10   :  { %47 = vsyncpa [#allocation4], 1 }

</bundles_post_ra>
